<compile_context>
chip_gen: v5e
topology: v5e:2x2
jax: 0.10.0
libtpu: 0.0.40
codegen_flags: <defaults>
</compile_context>

<pallas_src>
import jax
import jax.numpy as jnp
from jax.experimental import pallas as pl
from jax.experimental.pallas import tpu as pltpu


INPUT_DIMS = 5
NUM_LAYERS = 3
LAYER_WIDTH = [10, 10, 10]

_LANE = 128
_SUBLANE = 8


def _round_up(n, m):
    return (n + m - 1) // m * m


# ---------------------------------------------------------------------------
# Packed-parameter slab layout (computed once at import time).
#   weights are stored transposed: W_l^T has shape (out_l, in_l) at row _W_OFFS[l]
#   biases are stored as a column: b_l has shape (out_l,) at row _B_OFFS[l], lane 0
# ---------------------------------------------------------------------------
_DIMS = [INPUT_DIMS] + LAYER_WIDTH + [1]
_N_LAYERS = len(_DIMS) - 1

_W_OFFS, _B_OFFS = [], []
_row = 0
for _l in range(_N_LAYERS):
    _W_OFFS.append(_row)
    _row += _round_up(_DIMS[_l + 1], _SUBLANE)
for _l in range(_N_LAYERS):
    _B_OFFS.append(_row)
    _row += _round_up(_DIMS[_l + 1], _SUBLANE)
PACK_ROWS = _round_up(_row, _SUBLANE)


def pack_params(params):
    """Pack [(w, b), ...] (w: (in, out), b: (out,)) into one aligned f32 slab."""
    slab = jnp.zeros((PACK_ROWS, _LANE), jnp.float32)
    for (w, b), w_off, b_off in zip(params, _W_OFFS, _B_OFFS):
        wt = jnp.asarray(w, jnp.float32).T            # (out, in)
        slab = slab.at[w_off:w_off + wt.shape[0], :wt.shape[1]].set(wt)
        bcol = jnp.asarray(b, jnp.float32).reshape(-1)  # (out,)
        slab = slab.at[b_off:b_off + bcol.shape[0], 0].set(bcol)
    return slab


# ---------------------------------------------------------------------------
# Kernel: whole MLP fused, feature-major layout, batch on lanes.
# ---------------------------------------------------------------------------
def _mlp_kernel(p_ref, xt_ref, o_ref):
    h = xt_ref[...]                                    # (INPUT_DIMS, tile)
    for l in range(_N_LAYERS):
        in_d, out_d = _DIMS[l], _DIMS[l + 1]
        wt = p_ref[_W_OFFS[l]:_W_OFFS[l] + out_d, 0:in_d]   # (out, in)  static slice
        b = p_ref[_B_OFFS[l]:_B_OFFS[l] + out_d, 0:1]       # (out, 1)   static slice
        h = jnp.dot(wt, h, preferred_element_type=jnp.float32) + b
        if l < _N_LAYERS - 1:                          # ReLU on hidden layers only
            h = jnp.maximum(h, 0.0)
    o_ref[...] = h.astype(o_ref.dtype)                 # (1, tile): lane-dense store


@jax.jit
def feedforward_net_forward(x, packed_params):
    """FeedforwardNet forward. x: (batch, INPUT_DIMS). Returns (batch,)."""
    batch = x.shape[0]
    # Larger tiles amortize per-grid-step overhead for big candidate batches.
    tile = 512 if batch >= 512 else _LANE
    padded = _round_up(max(batch, 1), tile)

    # Feature-major, zero-padded input: batch maps to lanes.
    xt = jnp.zeros((INPUT_DIMS, padded), jnp.float32)
    xt = xt.at[:, :batch].set(jnp.asarray(x, jnp.float32).T)

    out = pl.pallas_call(
        _mlp_kernel,
        out_shape=jax.ShapeDtypeStruct((1, padded), jnp.float32),
        grid=(padded // tile,),
        in_specs=[
            # single packed param slab: constant block index -> one DMA, VMEM-resident
            pl.BlockSpec((PACK_ROWS, _LANE), lambda i: (0, 0)),
            # input streamed by batch tile
            pl.BlockSpec((INPUT_DIMS, tile), lambda i: (0, i)),
        ],
        out_specs=pl.BlockSpec((1, tile), lambda i: (0, i)),
        compiler_params=pltpu.CompilerParams(
            dimension_semantics=("parallel",),  # megacore-split batch tiles on v7x
        ),
    )(packed_params, xt)

    # undo padding + the .squeeze(1) from the PyTorch forward (fused under jit)
    return out[0, :batch]


# ---------------------------------------------------------------------------
# Parameter init matching the PyTorch module (xavier_uniform_ weights, zero bias).
# Weights stored as (in, out) = PyTorch W^T; distribution is identical.
# ---------------------------------------------------------------------------
def init_params(key):
    keys = jax.random.split(key, _N_LAYERS)
    params = []
    for i in range(_N_LAYERS):
        fan_in, fan_out = _DIMS[i], _DIMS[i + 1]
        a = (6.0 / (fan_in + fan_out)) ** 0.5
        w = jax.random.uniform(keys[i], (fan_in, fan_out), jnp.float32,
                               minval=-a, maxval=a)
        b = jnp.zeros((fan_out,), jnp.float32)
        params.append((w, b))
    return params


def _ref_forward(x, params):
    h = jnp.asarray(x, jnp.float32)
    for (w, b) in params[:-1]:
        h = jnp.maximum(h @ w + b[None, :], 0.0)
    wo, bo = params[-1]
    return (h @ wo + bo[None, :])[:, 0]


if __name__ == "__main__":
    key = jax.random.PRNGKey(0)
    pkey, xkey, rkey = jax.random.split(key, 3)

    # --- faithful-to-module init (xavier weights, zero biases) ---
    params = init_params(pkey)
    packed = pack_params(params)

    batch = 8
    x = jax.random.normal(xkey, (batch, INPUT_DIMS), jnp.float32)

    out = jax.block_until_ready(feedforward_net_forward(x, packed))
    ref = _ref_forward(x, params)
    assert out.shape == (batch,)
    assert jnp.allclose(out, ref, atol=1e-5, rtol=1e-5)

    # --- second check: fully random params (exercises bias path) and a batch
    #     size that doesn't divide the lane tile ---
    rkeys = jax.random.split(rkey, 2 * _N_LAYERS + 1)
    rparams = []
    for i in range(_N_LAYERS):
        w = jax.random.normal(rkeys[2 * i], (_DIMS[i], _DIMS[i + 1]), jnp.float32)
        b = jax.random.normal(rkeys[2 * i + 1], (_DIMS[i + 1],), jnp.float32)
        rparams.append((w, b))
    x2 = jax.random.normal(rkeys[-1], (37, INPUT_DIMS), jnp.float32)
    out2 = jax.block_until_ready(feedforward_net_forward(x2, pack_params(rparams)))
    ref2 = _ref_forward(x2, rparams)
    assert out2.shape == (37,)
    assert jnp.allclose(out2, ref2, atol=1e-4, rtol=1e-4)

    print("KERNEL_OK")
</pallas_src>

<mosaic_0001>
module attributes {stable_mosaic.version = 11 : i64} {
  func.func @_mlp_kernel(%arg0: i32, %arg1: memref<112x128xf32, #tpu.memory_space<vmem>>, %arg2: memref<5x128xf32, #tpu.memory_space<vmem>>, %arg3: memref<1x128xf32, #tpu.memory_space<vmem>>) attributes {dimension_semantics = [#tpu.dimension_semantics<parallel>], iteration_bounds = array<i64: 1>, scalar_prefetch = 0 : i64, scratch_operands = 0 : i64, tpu.core_type = #tpu.core_type<tc>, window_params = [{pipeline_mode = #tpu.pipeline_mode<synchronous>, transform_indices = @transform_0, window_bounds = array<i64: 112, 128>}, {transform_indices = @transform_1, window_bounds = array<i64: 5, 128>}, {transform_indices = @transform_2, window_bounds = array<i64: 1, 128>}]} {
    %c0 = arith.constant 0 : index
    %c0_0 = arith.constant 0 : index
    %0 = vector.load %arg2[%c0, %c0_0] : memref<5x128xf32, #tpu.memory_space<vmem>>, vector<5x128xf32>
    %c0_1 = arith.constant 0 : index
    %c0_2 = arith.constant 0 : index
    %1 = vector.load %arg1[%c0_1, %c0_2] : memref<112x128xf32, #tpu.memory_space<vmem>>, vector<10x5xf32>
    %c56 = arith.constant 56 : index
    %c0_3 = arith.constant 0 : index
    %2 = vector.load %arg1[%c56, %c0_3] : memref<112x128xf32, #tpu.memory_space<vmem>>, vector<10x1xf32>
    %cst = arith.constant dense<0.000000e+00> : vector<10x128xf32>
    %3 = tpu.matmul %1, %0, %cst {dimension_numbers = #tpu.dot_dimension_numbers<[1], [0], [0], [1], [0, 0, 1, 1], [], []>} : vector<10x5xf32>, vector<5x128xf32>, vector<10x128xf32> -> vector<10x128xf32>
    %4 = vector.broadcast %2 : vector<10x1xf32> to vector<10x128xf32>
    %5 = arith.addf %3, %4 : vector<10x128xf32>
    %cst_4 = arith.constant 0.000000e+00 : f32
    %6 = vector.broadcast %cst_4 : f32 to vector<10x128xf32>
    %7 = arith.maximumf %5, %6 : vector<10x128xf32>
    %c16 = arith.constant 16 : index
    %c0_5 = arith.constant 0 : index
    %8 = vector.load %arg1[%c16, %c0_5] : memref<112x128xf32, #tpu.memory_space<vmem>>, vector<10x10xf32>
    %c72 = arith.constant 72 : index
    %c0_6 = arith.constant 0 : index
    %9 = vector.load %arg1[%c72, %c0_6] : memref<112x128xf32, #tpu.memory_space<vmem>>, vector<10x1xf32>
    %cst_7 = arith.constant dense<0.000000e+00> : vector<10x128xf32>
    %10 = tpu.matmul %8, %7, %cst_7 {dimension_numbers = #tpu.dot_dimension_numbers<[1], [0], [0], [1], [0, 0, 1, 1], [], []>} : vector<10x10xf32>, vector<10x128xf32>, vector<10x128xf32> -> vector<10x128xf32>
    %11 = vector.broadcast %9 : vector<10x1xf32> to vector<10x128xf32>
    %12 = arith.addf %10, %11 : vector<10x128xf32>
    %cst_8 = arith.constant 0.000000e+00 : f32
    %13 = vector.broadcast %cst_8 : f32 to vector<10x128xf32>
    %14 = arith.maximumf %12, %13 : vector<10x128xf32>
    %c32 = arith.constant 32 : index
    %c0_9 = arith.constant 0 : index
    %15 = vector.load %arg1[%c32, %c0_9] : memref<112x128xf32, #tpu.memory_space<vmem>>, vector<10x10xf32>
    %c88 = arith.constant 88 : index
    %c0_10 = arith.constant 0 : index
    %16 = vector.load %arg1[%c88, %c0_10] : memref<112x128xf32, #tpu.memory_space<vmem>>, vector<10x1xf32>
    %cst_11 = arith.constant dense<0.000000e+00> : vector<10x128xf32>
    %17 = tpu.matmul %15, %14, %cst_11 {dimension_numbers = #tpu.dot_dimension_numbers<[1], [0], [0], [1], [0, 0, 1, 1], [], []>} : vector<10x10xf32>, vector<10x128xf32>, vector<10x128xf32> -> vector<10x128xf32>
    %18 = vector.broadcast %16 : vector<10x1xf32> to vector<10x128xf32>
    %19 = arith.addf %17, %18 : vector<10x128xf32>
    %cst_12 = arith.constant 0.000000e+00 : f32
    %20 = vector.broadcast %cst_12 : f32 to vector<10x128xf32>
    %21 = arith.maximumf %19, %20 : vector<10x128xf32>
    %c48 = arith.constant 48 : index
    %c0_13 = arith.constant 0 : index
    %22 = vector.load %arg1[%c48, %c0_13] : memref<112x128xf32, #tpu.memory_space<vmem>>, vector<1x10xf32>
    %c104 = arith.constant 104 : index
    %c0_14 = arith.constant 0 : index
    %23 = vector.load %arg1[%c104, %c0_14] : memref<112x128xf32, #tpu.memory_space<vmem>>, vector<1x1xf32>
    %cst_15 = arith.constant dense<0.000000e+00> : vector<1x128xf32>
    %24 = tpu.matmul %22, %21, %cst_15 {dimension_numbers = #tpu.dot_dimension_numbers<[1], [0], [0], [1], [0, 0, 1, 1], [], []>} : vector<1x10xf32>, vector<10x128xf32>, vector<1x128xf32> -> vector<1x128xf32>
    %25 = vector.broadcast %23 : vector<1x1xf32> to vector<1x128xf32>
    %26 = arith.addf %24, %25 : vector<1x128xf32>
    %c0_16 = arith.constant 0 : index
    %c0_17 = arith.constant 0 : index
    %27 = vector.load %arg3[%c0_16, %c0_17] : memref<1x128xf32, #tpu.memory_space<vmem>>, vector<1x128xf32>
    tpu.vector_store %arg3[%c0_16, %c0_17], %26 {strides = array<i32>} : memref<1x128xf32, #tpu.memory_space<vmem>>, vector<1x128xf32>,
    return
  }
  func.func @transform_0(%arg0: i32) -> (i32, i32) {
    %c0_i32 = arith.constant 0 : i32
    %c0_i32_0 = arith.constant 0 : i32
    %c0_i32_1 = arith.constant 0 : i32
    return %c0_i32, %c0_i32_0 : i32, i32
  }
  func.func @transform_1(%arg0: i32) -> (i32, i32) {
    %c0_i32 = arith.constant 0 : i32
    %c0_i32_0 = arith.constant 0 : i32
    return %c0_i32, %arg0 : i32, i32
  }
  func.func @transform_2(%arg0: i32) -> (i32, i32) {
    %c0_i32 = arith.constant 0 : i32
    %c0_i32_0 = arith.constant 0 : i32
    return %c0_i32, %arg0 : i32, i32
  }
}

</mosaic_0001>

<bundles_post_ra>
// kernel: feedforward_net_forward.1
= control target key start
LH: loop header
LB: loop body
LE: loop exit
PB: predicated region body
PF: predicated region fallthrough
CT: control target
= control target key end

     0   :  { %7 = vsyncpa [#allocation3], 0  ;;  %s259_s12 = smov [#allocation2]   ;;  %s260_s14 = smov 128   ;;  %s295_s0 = inlined_call_operand.hbm [shape: f32[112,128], index: 0, kind: input, shape index: {}]   ;;  %s296_s1 = inlined_call_operand.vmem [shape: f32[5,128], index: 1, kind: input, shape index: {}]   ;;  %s297_s2 = inlined_call_operand.vmem [shape: f32[1,128], index: 2, kind: output, shape index: {}]  }
   0x1   :  { %s12_s11 = sshll.u32 %s295_s0, 4  ;;  %s14_s13 = sshll.u32 %s259_s12, 4  ;;  %s13_s11 = int_to_ptr.hbm [resolvable:$true] %s12_s11  ;;  %s15_s13 = int_to_ptr.vmem [resolvable:$true] %s14_s13 }
   0x2   :  { %s261_s15 = smov 8  }
   0x3   :  { %20 = dma.hbm_to_vmem [thread:$0]  %s13_s11, 1792, %s15_s13, [#allocation3], %s260_s14, %s260_s14, %s261_s15  }
   0x4   :  { %257 = dma.done.wait [#allocation3], 1792  }
   0x5   :  { %258 = vsyncadd [#allocation3], 4294965504  ;;  %v262_v0 = vmov 0   ;;  %vm49_vm0 = vcmask 1044480   ;;  %vm42_vm1 = vcmask 39936   ;;  %v28_v3 = vld [vmem:[#allocation2] sm:$0xff] }
   0x6   :  { %230 = vset.pattern.permute.xlu0 %v262_v0  ;;  %231 = vset.pattern.permute.xlu1 %v262_v0  ;;  %v31_v1 = vld [vmem:[#allocation2 + $0x40] sm:$0x3]  ;;  %v30_v4 = vld [vmem:[#allocation2 + $0x38] sm:$0xff]  ;;  %v29_v5 = vld [vmem:[#allocation2 + $0x8] sm:$0x3]  ;;  %vm99_vm2 = vcmask 1041408  }
   0x7   :  { %232 = vset.pattern.permute.xlu2 %v262_v0  ;;  %v27_v2 = vld [vmem:[%s296_s1] sm:$0x1f]  ;;  %39 = vperm.xlu0 %230, %v31_v1   ;;  %v177_v6 = vld [vmem:[#allocation2 + $0x68] sm:$0x1]  ;;  %v81_v7 = vld [vmem:[#allocation2 + $0x50] sm:$0x3] }
   0x8   :  { %215 = vmatpush.msk.msra.mxu0 %vm49_vm0, %v27_v2  ;;  %89 = vperm.xlu1 %231, %v81_v7   ;;  %v80_v8 = vld [vmem:[#allocation2 + $0x48] sm:$0xff]  ;;  %v78_v17 = vld [vmem:[#allocation2 + $0x10] sm:$0xff]  ;;  %vm92_vm3 = vcmask 80896   ;;  %v79_v18 = vld [vmem:[#allocation2 + $0x18] sm:$0x3] }
   0x9   :  { %216 = vmatmul.msk.f32.vlgmr.msra.gmra.mxu0 %vm42_vm1, %v28_v3  ;;  %v131_v19 = vld [vmem:[#allocation2 + $0x60] sm:$0x3]  ;;  %v130_v21 = vld [vmem:[#allocation2 + $0x58] sm:$0xff]  ;;  %v129_v30 = vld [vmem:[#allocation2 + $0x28] sm:$0x3] }
   0xa   :  { %139 = vperm.xlu2 %232, %v131_v19   ;;  %v128_v29 = vld [vmem:[#allocation2 + $0x20] sm:$0xff]  ;;  %v176_v39 = vld [vmem:[#allocation2 + $0x30] sm:$0x1] }
   0xf   :  { %34 = vperm.xlu0 %230, %v30_v4  }
  0x10   :  { %84 = vperm.xlu1 %231, %v80_v8  }
  0x11   :  { %217 = vmatmul.msk.f32.gmra.mxu0 %vm42_vm1, %v29_v5 }
  0x12   :  { %134 = vperm.xlu2 %232, %v130_v21  }
  0x17   :  { %180 = vperm.xlu0 %230, %v177_v6  }
  0x64   :  { %v140_v31 = vpop.permute.xlu2 %139 }
  0x6c   :  { %v135_v33 = vpop.permute.xlu2 %134 }
  0x79   :  { %v40_v9 = vpop.permute.xlu0 %39 }
  0x7a   :  { %v90_v20 = vpop.permute.xlu1 %89 }
  0x81   :  { %v35_v11 = vpop.permute.xlu0 %34 }
  0x82   :  { %v85_v23 = vpop.permute.xlu1 %84 }
  0x86   :  { %v70_v10 = vpop.f32.mrf.mxu0 }
  0x87   :  { %v71_v13 = vadd.f32 %v70_v10, %v35_v11 }
  0x89   :  { %v76_v16 = vmax.f32 %v71_v13, 0.0  ;;  %v181_v40 = vpop.permute.xlu0 %180 }
  0x8e   :  { %v73_v12 = vpop.f32.mrf.mxu0 }
  0x8f   :  { %v74_v14 = vadd.f32 %v73_v12, %v40_v9 }
  0x91   :  { %v77_v15 = vmax.f32 %v74_v14, 0.0 }
  0x93   :  { %218 = vmatpush.msk.msra.mxu1 %vm99_vm2, %v77_v15 }
  0x95   :  { %118 = vmatpush.msra.mxu1 %v76_v16 }
  0x96   :  { %219 = vmatmul.msk.f32.vlgmr.msra.gmra.mxu1 %vm92_vm3, %v78_v17 }
  0x9e   :  { %220 = vmatmul.msk.f32.gmra.mxu1 %vm92_vm3, %v79_v18 }
 0x113   :  { %v120_v22 = vpop.f32.mrf.mxu1 }
 0x114   :  { %v121_v25 = vadd.f32 %v120_v22, %v85_v23 }
 0x116   :  { %v126_v28 = vmax.f32 %v121_v25, 0.0 }
 0x11b   :  { %v123_v24 = vpop.f32.mrf.mxu1 }
 0x11c   :  { %v124_v26 = vadd.f32 %v123_v24, %v90_v20 }
 0x11e   :  { %v127_v27 = vmax.f32 %v124_v26, 0.0 }
 0x120   :  { %221 = vmatpush.msk.msra.mxu2 %vm99_vm2, %v127_v27 }
 0x122   :  { %166 = vmatpush.msra.mxu2 %v126_v28 }
 0x123   :  { %222 = vmatmul.msk.f32.vlgmr.msra.gmra.mxu2 %vm92_vm3, %v128_v29 }
 0x12b   :  { %223 = vmatmul.msk.f32.gmra.mxu2 %vm92_vm3, %v129_v30 }
 0x1a6   :  { %v168_v32 = vpop.f32.mrf.mxu2 }
 0x1a7   :  { %v169_v35 = vadd.f32 %v168_v32, %v135_v33 }
 0x1a9   :  { %v174_v38 = vmax.f32 %v169_v35, 0.0 }
 0x1ae   :  { %v171_v34 = vpop.f32.mrf.mxu2 }
 0x1af   :  { %v172_v36 = vadd.f32 %v171_v34, %v140_v31 }
 0x1b1   :  { %v175_v37 = vmax.f32 %v172_v36, 0.0 }
 0x1b3   :  { %224 = vmatpush.msk.msra.mxu3 %vm99_vm2, %v175_v37 }
 0x1b5   :  { %204 = vmatpush.msra.mxu3 %v174_v38 }
 0x1b6   :  { %225 = vmatmul.msk.f32.vlgmr.msra.gmra.mxu3 %vm92_vm3, %v176_v39 }
 0x239   :  { %v206_v41 = vpop.f32.mrf.mxu3 }
 0x23a   :  { %v207_v42 = vadd.f32 %v206_v41, %v181_v40 }
 0x23c   :  { %209 = vst [vmem:[%s297_s2] sm:$0x1] %v207_v42 }
 0x23d   :  { %214 = vsyncpa [#allocation3], 1 }

</bundles_post_ra>
